<compile_context>
chip_gen: v6e
topology: v6e:2x2x1
jax: 0.10.0
libtpu: 0.0.40
codegen_flags: <defaults>
</compile_context>

<pallas_src>
import jax
import jax.numpy as jnp
import numpy as np
from jax import lax
from jax.experimental import pallas as pl
from jax.experimental.pallas import tpu as pltpu


def _vmem_spec():
    # whole (small) array resident in VMEM, no grid tiling
    return pl.BlockSpec(memory_space=pltpu.MemorySpace.VMEM)


# ---------------------------------------------------------------------------
# One fused Pallas kernel for the whole forward pass (closure over static
# shape constants / slab offsets).
# ---------------------------------------------------------------------------
def _make_fused_kernel(n_u, n_i, f_u, f_i, wcol, e_lbl):
    k1 = f_u + f_i                      # fused conv1 contraction dim
    # static row offsets into the packed weight slab (width = wcol)
    r_w1_ui = 0
    r_w1_iu = r_w1_ui + k1
    r_w2_ui = r_w1_iu + k1
    r_w2_iu = r_w2_ui + 2 * wcol
    r_b1_ui = r_w2_iu + 2 * wcol
    r_b1_iu = r_b1_ui + 1
    r_b2_ui = r_b1_iu + 1
    r_b2_iu = r_b2_ui + 1

    def kernel(idx_ref, a_ui_ref, a_iu_ref, xu_ref, xi_ref, w_ref, o_ref):
        f32 = jnp.float32
        a_ui = a_ui_ref[...]            # (n_i, n_u) row-normalized adjacency
        a_iu = a_iu_ref[...]            # (n_u, n_i)
        xu = xu_ref[...]                # (n_u, f_u)
        xi = xi_ref[...]                # (n_i, f_i)
        w = w_ref[...]                  # (slab_rows, wcol) packed params

        # static slab slices (free; offsets are Python ints)
        w1_ui = w[r_w1_ui:r_w1_ui + k1, :]            # [wl1_ui; wr1_ui]
        w1_iu = w[r_w1_iu:r_w1_iu + k1, :]            # [wl1_iu; wr1_iu]
        w2_ui = w[r_w2_ui:r_w2_ui + 2 * wcol, :]      # [wl2_ui; wr2_ui] (padded)
        w2_iu = w[r_w2_iu:r_w2_iu + 2 * wcol, :]
        b1_ui = w[r_b1_ui:r_b1_ui + 1, :]
        b1_iu = w[r_b1_iu:r_b1_iu + 1, :]
        b2_ui = w[r_b2_ui:r_b2_ui + 1, :]
        b2_iu = w[r_b2_iu:r_b2_iu + 1, :]

        # ---- conv1: lin_l + lin_r fused into ONE matmul per dst type ------
        agg_i = jnp.dot(a_ui, xu, preferred_element_type=f32)        # (n_i, f_u)
        h_i = jnp.maximum(
            jnp.dot(jnp.concatenate([agg_i, xi], axis=1), w1_ui,
                    preferred_element_type=f32) + b1_ui, 0.0)        # (n_i, wcol)
        agg_u = jnp.dot(a_iu, xi, preferred_element_type=f32)        # (n_u, f_i)
        h_u = jnp.maximum(
            jnp.dot(jnp.concatenate([agg_u, xu], axis=1), w1_iu,
                    preferred_element_type=f32) + b1_iu, 0.0)        # (n_u, wcol)

        # ---- conv2: same fusion (padded extra output cols are exactly 0) --
        agg2_i = jnp.dot(a_ui, h_u, preferred_element_type=f32)      # (n_i, wcol)
        z_i = (jnp.dot(jnp.concatenate([agg2_i, h_i], axis=1), w2_ui,
                       preferred_element_type=f32) + b2_ui)          # (n_i, wcol)
        agg2_u = jnp.dot(a_iu, h_i, preferred_element_type=f32)      # (n_u, wcol)
        z_u = (jnp.dot(jnp.concatenate([agg2_u, h_u], axis=1), w2_iu,
                       preferred_element_type=f32) + b2_iu)          # (n_u, wcol)

        # ---- decode: transposed one-hot gathers + sublane reduce ----------
        # (no (E,E) matmul, no eye mask; output stays lane-dense as (1, E))
        idx_u = idx_ref[0:1, :]                                      # (1, E)
        idx_i = idx_ref[1:2, :]
        oh_ut = (lax.broadcasted_iota(jnp.int32, (n_u, e_lbl), 0)
                 == idx_u).astype(f32)                               # (n_u, E)
        oh_it = (lax.broadcasted_iota(jnp.int32, (n_i, e_lbl), 0)
                 == idx_i).astype(f32)                               # (n_i, E)
        z1t = lax.dot_general(z_u, oh_ut, (((0,), (0,)), ((), ())),
                              preferred_element_type=f32)            # (wcol, E)
        z2t = lax.dot_general(z_i, oh_it, (((0,), (0,)), ((), ())),
                              preferred_element_type=f32)            # (wcol, E)
        d_row = jnp.sum(z1t * z2t, axis=0, keepdims=True)            # (1, E)

        # single store of the whole lane-dense row [-d | d]
        o_ref[...] = jnp.concatenate([-d_row, d_row], axis=1)

    return kernel


# ---------------------------------------------------------------------------
# Plain-JAX glue: adjacency build + parameter packing (hoisted out of the
# forward; graph and weights are static across calls).
# ---------------------------------------------------------------------------
def build_mean_adj(edge_index, n_dst, n_src):
    # scatter-mean expressed as a row-normalized dense adjacency (counts
    # duplicate edges, matching PyG's mean aggregation).
    src, dst = edge_index[0], edge_index[1]
    a = jnp.zeros((n_dst, n_src), jnp.float32).at[dst, src].add(1.0)
    deg = a.sum(axis=1, keepdims=True)
    return jnp.where(deg > 0, a / jnp.maximum(deg, 1.0), 0.0)


def pack_weight_slab(params, feat_dims, hidden, out_ch):
    """Pack all 12 weight/bias tensors into one (rows, wcol) f32 slab.

    Row layout:  [wl1_ui; wr1_ui] | [wl1_iu; wr1_iu] |
                 [wl2_ui; wr2_ui] | [wl2_iu; wr2_iu] |  b1_ui | b1_iu | b2_ui | b2_iu
    Column padding to wcol = max(hidden, out_ch) is zero, which makes the
    extra conv2 output channels exactly zero and hence invisible to decode.
    """
    et_ui = ("user", "rates", "item")
    et_iu = ("item", "rev_rates", "user")
    wcol = max(hidden, out_ch)
    f_u, f_i = feat_dims["user"], feat_dims["item"]

    def pad(m, rows, cols):
        return jnp.zeros((rows, cols), jnp.float32).at[:m.shape[0], :m.shape[1]].set(m)

    p1u, p1i = params["conv1"][et_ui], params["conv1"][et_iu]
    p2u, p2i = params["conv2"][et_ui], params["conv2"][et_iu]
    blocks = [
        jnp.concatenate([pad(p1u["wl"], f_u, wcol), pad(p1u["wr"], f_i, wcol)], axis=0),
        jnp.concatenate([pad(p1i["wl"], f_i, wcol), pad(p1i["wr"], f_u, wcol)], axis=0),
        jnp.concatenate([pad(p2u["wl"], wcol, wcol), pad(p2u["wr"], wcol, wcol)], axis=0),
        jnp.concatenate([pad(p2i["wl"], wcol, wcol), pad(p2i["wr"], wcol, wcol)], axis=0),
        pad(p1u["b"], 1, wcol), pad(p1i["b"], 1, wcol),
        pad(p2u["b"], 1, wcol), pad(p2i["b"], 1, wcol),
    ]
    return jnp.concatenate(blocks, axis=0), wcol


def simple_net_forward(w_slab, wcol, x_dict, adj_dict, edge_label_index):
    et_ui = ("user", "rates", "item")
    et_iu = ("item", "rev_rates", "user")
    a_ui, a_iu = adj_dict[et_ui], adj_dict[et_iu]
    xu, xi = x_dict["user"], x_dict["item"]
    n_u, f_u = xu.shape
    n_i, f_i = xi.shape
    e_lbl = edge_label_index.shape[1]
    idx = edge_label_index.astype(jnp.int32)                     # (2, E)

    args = (idx, a_ui, a_iu, xu, xi, w_slab)

    # advisory cost estimate for XLA's scheduler
    flops = 2 * (
        n_i * n_u * f_u + n_i * (f_u + f_i) * wcol
        + n_u * n_i * f_i + n_u * (f_u + f_i) * wcol
        + n_i * n_u * wcol + n_i * 2 * wcol * wcol
        + n_u * n_i * wcol + n_u * 2 * wcol * wcol
        + wcol * n_u * e_lbl + wcol * n_i * e_lbl) + wcol * e_lbl
    bytes_accessed = (sum(int(np.prod(a.shape)) * a.dtype.itemsize for a in args)
                      + 2 * e_lbl * 4)

    # Derive the VMEM limit from actual buffer sizes (+ intermediates and
    # (8,128)-tile padding headroom) instead of hard-coding.  The explicit
    # limit matters most on v5e (16 MiB default scoped VMEM) once A scales.
    interm_bytes = 4 * ((n_u + n_i) * (4 * wcol + f_u + f_i)
                        + (n_u + n_i) * e_lbl + 2 * wcol * e_lbl)
    vmem_limit = int(min(128 << 20,
                         max(4 << 20, 8 * (bytes_accessed + interm_bytes))))

    kernel = _make_fused_kernel(n_u, n_i, f_u, f_i, wcol, e_lbl)
    row = pl.pallas_call(
        kernel,
        out_shape=jax.ShapeDtypeStruct((1, 2 * e_lbl), jnp.float32),
        in_specs=[_vmem_spec()] * len(args),
        out_specs=_vmem_spec(),
        compiler_params=pltpu.CompilerParams(vmem_limit_bytes=vmem_limit),
        cost_estimate=pl.CostEstimate(flops=flops, transcendentals=0,
                                      bytes_accessed=bytes_accessed),
    )(*args)
    # torch.hstack((-out, out)).T on 1-D == concat(-out, out) -> shape (2E,).
    # The kernel already wrote the row as [-d | d]; just drop the unit dim.
    return row.reshape(-1)


# ---------------------------------------------------------------------------
# Pure-JAX reference (same math) used only to sanity-check the fused kernel.
# ---------------------------------------------------------------------------
def ref_forward(params, x_dict, adj_dict, edge_label_index, key, edge_types):
    def layer(xd, lp, relu):
        out = {}
        for et in edge_types:
            src, _, dst = et
            p = lp[et]
            y = (adj_dict[et] @ xd[src]) @ p["wl"] + xd[dst] @ p["wr"] + p["b"]
            out[dst] = y if dst not in out else out[dst] + y
        if relu:
            out = {k: jnp.maximum(v, 0.0) for k, v in out.items()}
        return out

    h = layer(x_dict, params["conv1"], True)
    z = layer(h, params["conv2"], False)
    d = jnp.sum(z[key[0]][edge_label_index[0]] *
                z[key[2]][edge_label_index[1]], axis=-1)
    return jnp.concatenate([-d, d], axis=0)


def init_params(rng, feat_dims, hidden, out_ch, edge_types):
    params = {"conv1": {}, "conv2": {}}
    for et in edge_types:
        src, _, dst = et
        layer_dims = {
            "conv1": (feat_dims[src], feat_dims[dst], hidden),
            "conv2": (hidden, hidden, out_ch),
        }
        for name, (fin_src, fin_dst, fout) in layer_dims.items():
            rng, k1, k2, k3 = jax.random.split(rng, 4)
            sl = 1.0 / np.sqrt(fin_src)
            sr = 1.0 / np.sqrt(fin_dst)
            params[name][et] = {
                "wl": jax.random.uniform(k1, (fin_src, fout), jnp.float32, -sl, sl),
                "wr": jax.random.uniform(k2, (fin_dst, fout), jnp.float32, -sr, sr),
                "b": jax.random.uniform(k3, (1, fout), jnp.float32, -sl, sl),
            }
    return params


if __name__ == "__main__":
    hidden_channels, out_channels = 32, 16
    node_counts = {"user": 12, "item": 10}
    feat_dims = {"user": 8, "item": 6}
    edge_types = (("user", "rates", "item"), ("item", "rev_rates", "user"))
    key = ("user", "rates", "item")
    E, E_LBL = 20, 8

    rng = jax.random.PRNGKey(0)
    rng, *ks = jax.random.split(rng, 9)

    x_dict = {
        "user": jax.random.normal(ks[0], (node_counts["user"], feat_dims["user"]), jnp.float32),
        "item": jax.random.normal(ks[1], (node_counts["item"], feat_dims["item"]), jnp.float32),
    }
    edge_index_dict = {
        ("user", "rates", "item"): jnp.stack([
            jax.random.randint(ks[2], (E,), 0, node_counts["user"]),
            jax.random.randint(ks[3], (E,), 0, node_counts["item"]),
        ]).astype(jnp.int32),
        ("item", "rev_rates", "user"): jnp.stack([
            jax.random.randint(ks[4], (E,), 0, node_counts["item"]),
            jax.random.randint(ks[5], (E,), 0, node_counts["user"]),
        ]).astype(jnp.int32),
    }
    edge_label_index = jnp.stack([
        jax.random.randint(ks[6], (E_LBL,), 0, node_counts["user"]),
        jax.random.randint(ks[7], (E_LBL,), 0, node_counts["item"]),
    ]).astype(jnp.int32)

    params = init_params(rng, feat_dims, hidden_channels, out_channels, edge_types)

    # Adjacency build + weight packing hoisted out of the forward
    # (static graph / static weights -> computed once).
    adj_dict = {
        et: build_mean_adj(edge_index_dict[et],
                           node_counts[et[2]], node_counts[et[0]])
        for et in edge_types
    }
    w_slab, wcol = pack_weight_slab(params, feat_dims, hidden_channels, out_channels)

    out = simple_net_forward(w_slab, wcol, x_dict, adj_dict, edge_label_index)
    out = jax.block_until_ready(out)

    ref = ref_forward(params, x_dict, adj_dict, edge_label_index, key, edge_types)

    assert out.shape == (2 * E_LBL,)
    np.testing.assert_allclose(np.asarray(out), np.asarray(ref),
                               rtol=2e-3, atol=2e-3)
    print("KERNEL_OK")
</pallas_src>

<mosaic_0001>
module attributes {stable_mosaic.version = 11 : i64} {
  func.func @kernel(%arg0: memref<2x8xi32, #tpu.memory_space<vmem>>, %arg1: memref<10x12xf32, #tpu.memory_space<vmem>>, %arg2: memref<12x10xf32, #tpu.memory_space<vmem>>, %arg3: memref<12x8xf32, #tpu.memory_space<vmem>>, %arg4: memref<10x6xf32, #tpu.memory_space<vmem>>, %arg5: memref<160x32xf32, #tpu.memory_space<vmem>>, %arg6: memref<1x16xf32, #tpu.memory_space<vmem>>) attributes {dimension_semantics = [], scalar_prefetch = 0 : i64, scratch_operands = 0 : i64, tpu.core_type = #tpu.core_type<tc>} {
    %c0 = arith.constant 0 : index
    %c0_0 = arith.constant 0 : index
    %0 = vector.load %arg1[%c0, %c0_0] : memref<10x12xf32, #tpu.memory_space<vmem>>, vector<10x12xf32>
    %c0_1 = arith.constant 0 : index
    %c0_2 = arith.constant 0 : index
    %1 = vector.load %arg2[%c0_1, %c0_2] : memref<12x10xf32, #tpu.memory_space<vmem>>, vector<12x10xf32>
    %c0_3 = arith.constant 0 : index
    %c0_4 = arith.constant 0 : index
    %2 = vector.load %arg3[%c0_3, %c0_4] : memref<12x8xf32, #tpu.memory_space<vmem>>, vector<12x8xf32>
    %c0_5 = arith.constant 0 : index
    %c0_6 = arith.constant 0 : index
    %3 = vector.load %arg4[%c0_5, %c0_6] : memref<10x6xf32, #tpu.memory_space<vmem>>, vector<10x6xf32>
    %c0_7 = arith.constant 0 : index
    %c0_8 = arith.constant 0 : index
    %4 = vector.load %arg5[%c0_7, %c0_8] : memref<160x32xf32, #tpu.memory_space<vmem>>, vector<160x32xf32>
    %5 = vector.extract_strided_slice %4 {offsets = [0, 0], sizes = [14, 32], strides = [1, 1]} : vector<160x32xf32> to vector<14x32xf32>
    %6 = vector.extract_strided_slice %4 {offsets = [14, 0], sizes = [14, 32], strides = [1, 1]} : vector<160x32xf32> to vector<14x32xf32>
    %7 = vector.extract_strided_slice %4 {offsets = [28, 0], sizes = [64, 32], strides = [1, 1]} : vector<160x32xf32> to vector<64x32xf32>
    %8 = vector.extract_strided_slice %4 {offsets = [92, 0], sizes = [64, 32], strides = [1, 1]} : vector<160x32xf32> to vector<64x32xf32>
    %9 = vector.extract_strided_slice %4 {offsets = [156, 0], sizes = [1, 32], strides = [1, 1]} : vector<160x32xf32> to vector<1x32xf32>
    %10 = vector.extract_strided_slice %4 {offsets = [157, 0], sizes = [1, 32], strides = [1, 1]} : vector<160x32xf32> to vector<1x32xf32>
    %11 = vector.extract_strided_slice %4 {offsets = [158, 0], sizes = [1, 32], strides = [1, 1]} : vector<160x32xf32> to vector<1x32xf32>
    %12 = vector.extract_strided_slice %4 {offsets = [159, 0], sizes = [1, 32], strides = [1, 1]} : vector<160x32xf32> to vector<1x32xf32>
    %cst = arith.constant dense<0.000000e+00> : vector<10x8xf32>
    %13 = tpu.matmul %0, %2, %cst {dimension_numbers = #tpu.dot_dimension_numbers<[1], [0], [0], [1], [0, 0, 1, 1], [], []>} : vector<10x12xf32>, vector<12x8xf32>, vector<10x8xf32> -> vector<10x8xf32>
    %14 = tpu.concatenate %13, %3 in 1 : vector<10x8xf32>, vector<10x6xf32> -> vector<10x14xf32>
    %cst_9 = arith.constant dense<0.000000e+00> : vector<10x32xf32>
    %15 = tpu.matmul %14, %5, %cst_9 {dimension_numbers = #tpu.dot_dimension_numbers<[1], [0], [0], [1], [0, 0, 1, 1], [], []>} : vector<10x14xf32>, vector<14x32xf32>, vector<10x32xf32> -> vector<10x32xf32>
    %16 = vector.broadcast %9 : vector<1x32xf32> to vector<10x32xf32>
    %17 = arith.addf %15, %16 : vector<10x32xf32>
    %cst_10 = arith.constant 0.000000e+00 : f32
    %18 = vector.broadcast %cst_10 : f32 to vector<10x32xf32>
    %19 = arith.maximumf %17, %18 : vector<10x32xf32>
    %cst_11 = arith.constant dense<0.000000e+00> : vector<12x6xf32>
    %20 = tpu.matmul %1, %3, %cst_11 {dimension_numbers = #tpu.dot_dimension_numbers<[1], [0], [0], [1], [0, 0, 1, 1], [], []>} : vector<12x10xf32>, vector<10x6xf32>, vector<12x6xf32> -> vector<12x6xf32>
    %21 = tpu.concatenate %20, %2 in 1 : vector<12x6xf32>, vector<12x8xf32> -> vector<12x14xf32>
    %cst_12 = arith.constant dense<0.000000e+00> : vector<12x32xf32>
    %22 = tpu.matmul %21, %6, %cst_12 {dimension_numbers = #tpu.dot_dimension_numbers<[1], [0], [0], [1], [0, 0, 1, 1], [], []>} : vector<12x14xf32>, vector<14x32xf32>, vector<12x32xf32> -> vector<12x32xf32>
    %23 = vector.broadcast %10 : vector<1x32xf32> to vector<12x32xf32>
    %24 = arith.addf %22, %23 : vector<12x32xf32>
    %cst_13 = arith.constant 0.000000e+00 : f32
    %25 = vector.broadcast %cst_13 : f32 to vector<12x32xf32>
    %26 = arith.maximumf %24, %25 : vector<12x32xf32>
    %cst_14 = arith.constant dense<0.000000e+00> : vector<10x32xf32>
    %27 = tpu.matmul %0, %26, %cst_14 {dimension_numbers = #tpu.dot_dimension_numbers<[1], [0], [0], [1], [0, 0, 1, 1], [], []>} : vector<10x12xf32>, vector<12x32xf32>, vector<10x32xf32> -> vector<10x32xf32>
    %28 = tpu.concatenate %27, %19 in 1 : vector<10x32xf32>, vector<10x32xf32> -> vector<10x64xf32>
    %cst_15 = arith.constant dense<0.000000e+00> : vector<10x32xf32>
    %29 = tpu.matmul %28, %7, %cst_15 {dimension_numbers = #tpu.dot_dimension_numbers<[1], [0], [0], [1], [0, 0, 1, 1], [], []>} : vector<10x64xf32>, vector<64x32xf32>, vector<10x32xf32> -> vector<10x32xf32>
    %30 = vector.broadcast %11 : vector<1x32xf32> to vector<10x32xf32>
    %31 = arith.addf %29, %30 : vector<10x32xf32>
    %cst_16 = arith.constant dense<0.000000e+00> : vector<12x32xf32>
    %32 = tpu.matmul %1, %19, %cst_16 {dimension_numbers = #tpu.dot_dimension_numbers<[1], [0], [0], [1], [0, 0, 1, 1], [], []>} : vector<12x10xf32>, vector<10x32xf32>, vector<12x32xf32> -> vector<12x32xf32>
    %33 = tpu.concatenate %32, %26 in 1 : vector<12x32xf32>, vector<12x32xf32> -> vector<12x64xf32>
    %cst_17 = arith.constant dense<0.000000e+00> : vector<12x32xf32>
    %34 = tpu.matmul %33, %8, %cst_17 {dimension_numbers = #tpu.dot_dimension_numbers<[1], [0], [0], [1], [0, 0, 1, 1], [], []>} : vector<12x64xf32>, vector<64x32xf32>, vector<12x32xf32> -> vector<12x32xf32>
    %35 = vector.broadcast %12 : vector<1x32xf32> to vector<12x32xf32>
    %36 = arith.addf %34, %35 : vector<12x32xf32>
    %c0_18 = arith.constant 0 : index
    %c0_19 = arith.constant 0 : index
    %37 = vector.load %arg0[%c0_18, %c0_19] : memref<2x8xi32, #tpu.memory_space<vmem>>, vector<1x8xi32>
    %c1 = arith.constant 1 : index
    %c0_20 = arith.constant 0 : index
    %38 = vector.load %arg0[%c1, %c0_20] : memref<2x8xi32, #tpu.memory_space<vmem>>, vector<1x8xi32>
    %39 = tpu.iota {dimensions = array<i32: 0>} : vector<12x8xi32>
    %40 = vector.broadcast %37 : vector<1x8xi32> to vector<12x8xi32>
    %41 = arith.cmpi eq, %39, %40 : vector<12x8xi32>
    %42 = arith.extui %41 : vector<12x8xi1> to vector<12x8xi32>
    %43 = arith.sitofp %42 : vector<12x8xi32> to vector<12x8xf32>
    %44 = tpu.iota {dimensions = array<i32: 0>} : vector<10x8xi32>
    %45 = vector.broadcast %38 : vector<1x8xi32> to vector<10x8xi32>
    %46 = arith.cmpi eq, %44, %45 : vector<10x8xi32>
    %47 = arith.extui %46 : vector<10x8xi1> to vector<10x8xi32>
    %48 = arith.sitofp %47 : vector<10x8xi32> to vector<10x8xf32>
    %cst_21 = arith.constant dense<0.000000e+00> : vector<32x8xf32>
    %49 = tpu.matmul %36, %43, %cst_21 {dimension_numbers = #tpu.dot_dimension_numbers<[0], [0], [1], [1], [0, 1, 1, 1], [], []>} : vector<12x32xf32>, vector<12x8xf32>, vector<32x8xf32> -> vector<32x8xf32>
    %cst_22 = arith.constant dense<0.000000e+00> : vector<32x8xf32>
    %50 = tpu.matmul %31, %48, %cst_22 {dimension_numbers = #tpu.dot_dimension_numbers<[0], [0], [1], [1], [0, 1, 1, 1], [], []>} : vector<10x32xf32>, vector<10x8xf32>, vector<32x8xf32> -> vector<32x8xf32>
    %51 = arith.mulf %49, %50 : vector<32x8xf32>
    %cst_23 = arith.constant dense<0.000000e+00> : vector<8xf32>
    %52 = vector.multi_reduction <add>, %51, %cst_23 [0] : vector<32x8xf32> to vector<8xf32>
    %53 = vector.shape_cast %52 : vector<8xf32> to vector<1x8xf32>
    %cst_24 = arith.constant 0.000000e+00 : f32
    %54 = vector.broadcast %cst_24 : f32 to vector<1x8xf32>
    %55 = arith.subf %54, %53 : vector<1x8xf32>
    %56 = tpu.concatenate %55, %53 in 1 : vector<1x8xf32>, vector<1x8xf32> -> vector<1x16xf32>
    %c0_25 = arith.constant 0 : index
    %c0_26 = arith.constant 0 : index
    %57 = vector.load %arg6[%c0_25, %c0_26] : memref<1x16xf32, #tpu.memory_space<vmem>>, vector<1x16xf32>
    tpu.vector_store %arg6[%c0_25, %c0_26], %56 {strides = array<i32>} : memref<1x16xf32, #tpu.memory_space<vmem>>, vector<1x16xf32>,
    return
  }
}

</mosaic_0001>

<bundles_post_ra>
// kernel: tpu_custom_call.1
= control target key start
LH: loop header
LB: loop body
LE: loop exit
PB: predicated region body
PF: predicated region fallthrough
CT: control target
= control target key end

     0   :  { %vm59_vm0 = vcmask 1043456   ;;  %vm248_vm1 = vcmask 1041408   ;;  %vm52_vm2 = vcmask 97280   ;;  %vm241_vm3 = vcmask 80896   ;;  %s1637_s0 = inlined_call_operand.vmem [shape: s32[2,8], index: 0, kind: input, shape index: {}]   ;;  %s1638_s1 = inlined_call_operand.vmem [shape: f32[10,12], index: 1, kind: input, shape index: {}]   ;;  %s1639_s2 = inlined_call_operand.vmem [shape: f32[12,10], index: 2, kind: input, shape index: {}]   ;;  %s1640_s3 = inlined_call_operand.vmem [shape: f32[12,8], index: 3, kind: input, shape index: {}]   ;;  %s1641_s4 = inlined_call_operand.vmem [shape: f32[10,6], index: 4, kind: input, shape index: {}]   ;;  %s1642_s5 = inlined_call_operand.vmem [shape: f32[160,32], index: 5, kind: input, shape index: {}]   ;;  %s1643_s6 = inlined_call_operand.hbm [shape: f32[1,16], index: 6, kind: output, shape index: {}]  }
   0x1   :  { %v29_v0 = vld [vmem:[%s1640_s3 + $0x8] sm:$0xf]  ;;  %v28_v2 = vld [vmem:[%s1640_s3] sm:$0xff] }
   0x2   :  { %v31_v1 = vld [vmem:[%s1641_s4 + $0x8] sm:$0x3]  ;;  %1268 = vmatprep.subr.msk.mxu1 %vm59_vm0, %v29_v0  ;;  %v24_v3 = vld [vmem:[%s1638_s1] sm:$0xff] }
   0x3   :  { %1282 = vmatprep.subr.msk.mxu0 %vm248_vm1, %v31_v1  ;;  %v30_v4 = vld [vmem:[%s1641_s4] sm:$0xff]  ;;  %1269 = vmatpush3.msk.msra.mxu1 %vm59_vm0, %v29_v0  ;;  %v1459_v5 = vld [vmem:[%s1638_s1 + $0x8] sm:$0x3] }
   0x4   :  { %1283 = vmatpush3.msk.msra.mxu0 %vm248_vm1, %v31_v1  ;;  %1270 = vmatprep.subr.mxu1 %v28_v2  ;;  %v1465_v6 = vld [vmem:[%s1639_s2] sm:$0xff] }
   0x5   :  { %1272 = vmatprep.mubr.msk.f32.mxu1 %vm52_vm2, %v24_v3 }
   0x6   :  { %11 = vsyncpa [#allocation3], 0  ;;  %1271 = vmatpush3.msra.mxu1 %v28_v2  ;;  %1284 = vmatprep.subr.mxu0 %v30_v4  ;;  %v1470_v7 = vld [vmem:[%s1639_s2 + $0x8] sm:$0xf]  ;;  %s1396_s1 = smov 8   ;;  %s1397_s11 = smov 6   ;;  %v149_v29 = vlaneseq }
   0x7   :  { %1273 = vmatmul.mubr.msk.f32.vlgmr.msra.gmra.mxu1 %vm52_vm2, %v1459_v5  ;;  %1285 = vmatpush3.msra.mxu0 %v30_v4  ;;  %v33_v8 = vld [vmem:[%s1642_s5 + $0x8] sm:$0xff]  ;;  %vm160_vm4 = vcmask 1045504   ;;  %v34_v10 = vld [vmem:[%s1642_s5 + $0x10] sm:$0xff]  ;;  %v1491_v11 = vld [vmem:[%s1642_s5 + $0x18] sm:$0xff]  ;;  %vm146_vm5 = vcmask 64512   ;;  %vm153_vm6 = vcmask 113664  }
   0x8   :  { %1286 = vmatprep.mubr.msk.f32.mxu0 %vm241_vm3, %v1465_v6  ;;  %140 = vrot.lane.b32.xlu0 %v30_v4, %s1396_s1  ;;  %v342_v9 = vrot.slane %v33_v8, 6  ;;  %v32_v12 = vld [vmem:[%s1642_s5] sm:$0xff]  ;;  %v343_v13 = vrot.slane %v34_v10, 6  ;;  %v345_v14 = vrot.slane %v1491_v11, 6  ;;  %vm333_vm7 = vcmask 48128   ;;  %v1515_v33 = vld [vmem:[%s1642_s5 + $0x98] sm:$0xff] }
   0x9   :  { %1287 = vmatmul.mubr.msk.f32.vlgmr.msra.gmra.mxu0 %vm241_vm3, %v1470_v7  ;;  %327 = vrot.lane.b32.xlu1 %v28_v2, %s1397_s11  ;;  %v1508_v30 = vshrl.u32 %v149_v29, 7  ;;  %v42_v37 = vld [vmem:[%s1642_s5 + $0x50] sm:$0xff]  ;;  %v1525_v38 = vld [vmem:[%s1642_s5 + $0x58] sm:$0xff]  ;;  %v41_v39 = vld [vmem:[%s1642_s5 + $0x48] sm:$0xff]  ;;  %s1398_s7 = smov 32   ;;  %vm519_vm8 = vcmask 261120  }
   0xa   :  { %1300 = vmatprep.mubr.msk.f32.mxu0 %vm52_vm2, %v24_v3  ;;  %1275 = vmatprep.subr.msk.mxu1 %vm160_vm4, %v33_v8  ;;  %v346_v15 = vsel %vm248_vm1, %v343_v13, %v345_v14  ;;  %v344_v16 = vsel %vm248_vm1, %v342_v9, %v343_v13  ;;  %v547_v41 = vrot.slane %v42_v37, 4  ;;  %v549_v42 = vrot.slane %v1525_v38, 4  ;;  %v40_v44 = vld [vmem:[%s1642_s5 + $0x40] sm:$0xff]  ;;  %v39_v55 = vld [vmem:[%s1642_s5 + $0x38] sm:$0xff]  ;;  %v50_v58 = vld [vmem:[%s1642_s5 + $0x90] sm:$0xff] }
   0xb   :  { %1276 = vmatpush3.msk.msra.mxu1 %vm160_vm4, %v33_v8  ;;  %v151_v31 = vsub.s32 4, %v1508_v30  ;;  %v338_v32 = vsub.s32 5, %v1508_v30  ;;  %v545_v43 = vrot.slane %v41_v39, 4  ;;  %v543_v46 = vrot.slane %v40_v44, 4  ;;  %v49_v61 = vld [vmem:[%s1642_s5 + $0x88] sm:$0xff]  ;;  %v38_v62 = vld [vmem:[%s1642_s5 + $0x30] sm:$0xff] }
   0xc   :  { %142 = vrot.lane.b32.xlu0 %v31_v1, %s1396_s1  ;;  %1277 = vmatprep.subr.mxu1 %v32_v12  ;;  %v550_v48 = vsel %vm59_vm0, %v547_v41, %v549_v42  ;;  %v541_v60 = vrot.slane %v39_v55, 4  ;;  %v753_v1 = vrot.slane %v1515_v33, 4  ;;  %v48_v2 = vld [vmem:[%s1642_s5 + $0x80] sm:$0xff]  ;;  %v37_v3 = vld [vmem:[%s1642_s5 + $0x28] sm:$0xff]  ;;  %v749_v4 = vrot.slane %v49_v61, 4  ;;  %v47_v10 = vld [vmem:[%s1642_s5 + $0x78] sm:$0xff] }
   0xd   :  { %329 = vrot.lane.b32.xlu1 %v29_v0, %s1397_s11  ;;  %1278 = vmatpush3.msra.mxu1 %v32_v12  ;;  %v152_v35 = vrot.slane %v1515_v33, %v151_v31  ;;  %v339_v36 = vrot.slane %v1515_v33, %v338_v32  ;;  %v548_v49 = vsel %vm59_vm0, %v545_v43, %v547_v41  ;;  %v751_v0 = vrot.slane %v50_v58, 4 }
   0xe   :  { %1289 = vmatprep.subr.msk.mxu1 %vm160_vm4, %v346_v15  ;;  %v546_v54 = vsel %vm59_vm0, %v543_v46, %v545_v43  ;;  %v539_v8 = vrot.slane %v38_v62, 4  ;;  %v544_v9 = vsel %vm59_vm0, %v541_v60, %v543_v46  ;;  %v747_v13 = vrot.slane %v48_v2, 4 }
   0xf   :  { %v754_v12 = vsel %vm59_vm0, %v751_v0, %v753_v1  ;;  %v537_v14 = vrot.slane %v37_v3, 4  ;;  %vm559_vm9 = vcmask 523264   ;;  %v1399_v55 = vmov 0.0  }
  0x10   :  { %vm1156_vm14 = vcmask 122880  }
  0x7a   :  { %v141_v17 = vpop.permute.xlu0 %140 }
  0x7b   :  { %v328_v18 = vpop.permute.xlu1 %327 }
  0x7e   :  { %v143_v20 = vpop.permute.xlu0 %142 }
  0x7f   :  { %v330_v27 = vpop.permute.xlu1 %329 }
  0xc7   :  { %v1274_v19 = vpop.f32.mrf.mxu1 }
  0xc8   :  { %v148_v24 = vsel %vm146_vm5, %v1274_v19, %v143_v20  ;;  %v46_v19 = vld [vmem:[%s1642_s5 + $0x70] sm:$0xff] }
  0xc9   :  { %v1288_v21 = vpop.f32.mrf.mxu0  ;;  %v129_v22 = vpop.f32.mrf.mxu1 }
  0xca   :  { %v147_v23 = vsel %vm146_vm5, %v129_v22, %v141_v17  ;;  %v335_v28 = vsel %vm333_vm7, %v1288_v21, %v330_v27  ;;  %v540_v17 = vsel %vm59_vm0, %v537_v14, %v539_v8  ;;  %v743_v21 = vrot.slane %v46_v19, 4  ;;  %v45_v22 = vld [vmem:[%s1642_s5 + $0x68] sm:$0xff]  ;;  %v44_v27 = vld [vmem:[%s1642_s5 + $0x60] sm:$0xff] }
  0xcb   :  { %v317_v25 = vpop.f32.mrf.mxu0  ;;  %1279 = vmatprep.mubr.msk.f32.mxu1 %vm153_vm6, %v147_v23  ;;  %v739_v31 = vrot.slane %v44_v27, 4 }
  0xcc   :  { %v334_v26 = vsel %vm333_vm7, %v317_v25, %v328_v18  ;;  %1280 = vmatmul.mubr.msk.f32.vlgmr.msra.gmra.mxu1 %vm153_vm6, %v148_v24  ;;  %v534_v25 = vrot.slane %v1491_v11, 4 }
  0xcd   :  { %1290 = vmatpush3.msk.msra.mxu1 %vm160_vm4, %v346_v15  ;;  %1293 = vmatprep.mubr.msk.f32.mxu1 %vm153_vm6, %v334_v26  ;;  %v542_v15 = vsel %vm59_vm0, %v539_v8, %v541_v60  ;;  %v741_v26 = vrot.slane %v45_v22, 4  ;;  %v740_v32 = vsel %vm59_vm0, %v549_v42, %v739_v31  ;;  %v524_v42 = vsub.s32 6, %v1508_v30 }
  0xce   :  { %1291 = vmatprep.subr.mxu1 %v344_v16 }
  0xcf   :  { %1292 = vmatpush3.msra.mxu1 %v344_v16  ;;  %v745_v16 = vrot.slane %v47_v10, 4  ;;  %v744_v29 = vsel %vm59_vm0, %v741_v26, %v743_v21  ;;  %v742_v11 = vsel %vm59_vm0, %v739_v31, %v741_v26 }
  0xd0   :  { %1294 = vmatmul.mubr.msk.f32.vlgmr.msra.gmra.mxu1 %vm153_vm6, %v335_v28  ;;  %1303 = vmatprep.subr.mxu1 %v550_v48 }
  0xd1   :  { %1304 = vmatpush3.msra.mxu1 %v550_v48  ;;  %v748_v18 = vsel %vm59_vm0, %v745_v16, %v747_v13  ;;  %v746_v24 = vsel %vm59_vm0, %v743_v21, %v745_v16  ;;  %v525_v48 = vrot.slane %v1515_v33, %v524_v42 }
  0xd2   :  { %1305 = vmatprep.subr.mxu1 %v548_v49 }
  0xd3   :  { %1306 = vmatpush3.msra.mxu1 %v548_v49  ;;  %v729_v49 = vsub.s32 7, %v1508_v30 }
  0xd4   :  { %1307 = vmatprep.subr.mxu1 %v546_v54 }
  0xd5   :  { %1308 = vmatpush3.msra.mxu1 %v546_v54  ;;  %v730_v58 = vrot.slane %v1515_v33, %v729_v49 }
  0xd6   :  { %1309 = vmatprep.subr.mxu1 %v544_v9 }
  0xd7   :  { %1310 = vmatpush3.msra.mxu1 %v544_v9 }
  0xd8   :  { %1311 = vmatprep.subr.mxu1 %v542_v15 }
  0xd9   :  { %1312 = vmatpush3.msra.mxu1 %v542_v15 }
  0xda   :  { %1313 = vmatprep.subr.mxu1 %v540_v17 }
  0xdb   :  { %1314 = vmatpush3.msra.mxu1 %v540_v17 }
 0x18c   :  { %v1281_v34 = vpop.f32.mrf.mxu1 }
 0x18d   :  { %v236_v52 = vadd.f32 %v1281_v34, %v152_v35 }
 0x18e   :  { %v230_v40 = vpop.f32.mrf.mxu1 }
 0x18f   :  { %v231_v45 = vadd.f32 %v230_v40, %v152_v35  ;;  %v240_v63 = vmax.f32 %v236_v52, 0.0 }
 0x190   :  { %v1295_v47 = vpop.f32.mrf.mxu1 }
 0x191   :  { %v239_v50 = vmax.f32 %v231_v45, 0.0  ;;  %v428_v51 = vadd.f32 %v1295_v47, %v339_v36 }
 0x192   :  { %v422_v53 = vpop.f32.mrf.mxu1 }
 0x193   :  { %v432_v56 = vmax.f32 %v428_v51, 0.0  ;;  %v423_v57 = vadd.f32 %v422_v53, %v339_v36  ;;  %513 = vrot.lane.b32.xlu0 %v239_v50, %s1398_s7  ;;  %v848_v51 = vadd.s32 8, %v1508_v30 }
 0x195   :  { %v431_v59 = vmax.f32 %v423_v57, 0.0  ;;  %1296 = vmatprep.subr.msk.mxu0 %vm59_vm0, %v432_v56  ;;  %v1194_v57 = vld [vmem:[%s1637_s0] ss:$0 sm:$0xff] }
 0x196   :  { %1297 = vmatpush3.msk.msra.mxu0 %vm59_vm0, %v432_v56  ;;  %vm854_vm11 = vcmp.eq.s32.totalorder %v848_v51, %v1194_v57  ;;  %vm853_vm13 = vcmp.eq.s32.totalorder %v1508_v30, %v1194_v57 }
 0x197   :  { %719 = vrot.lane.b32.xlu1 %v431_v59, %s1398_s7  ;;  %1298 = vmatprep.subr.mxu0 %v431_v59  ;;  %v1196_v60 = vsel %vm854_vm11, 1.0, %v1399_v55 }
 0x198   :  { %515 = vrot.lane.b32.xlu0 %v240_v63, %s1398_s7  ;;  %1299 = vmatpush3.msra.mxu0 %v431_v59 }
 0x199   :  { %1301 = vmatmul.mubr.msk.f32.vlgmr.msra.gmra.mxu0 %vm52_vm2, %v1459_v5  ;;  %1322 = vmatprep.subr.msk.mxu0 %vm248_vm1, %v240_v63  ;;  %v752_v5 = vsel %vm59_vm0, %v749_v4, %v751_v0 }
 0x19a   :  { %1323 = vmatpush3.msk.msra.mxu0 %vm248_vm1, %v240_v63  ;;  %1326 = vmatprep.mubr.msk.f32.mxu0 %vm241_vm3, %v1465_v6  ;;  %v750_v6 = vsel %vm59_vm0, %v747_v13, %v749_v4  ;;  %v1400_v63 = vmov 1.0  }
 0x19b   :  { %721 = vrot.lane.b32.xlu1 %v432_v56, %s1398_s7  ;;  %1324 = vmatprep.subr.mxu0 %v239_v50 }
 0x19c   :  { %1325 = vmatpush3.msra.mxu0 %v239_v50  ;;  %v1197_v50 = vld [vmem:[%s1637_s0 + $0x1] ss:$0 sm:$0xff]  ;;  %s1401_s0 = smov [#allocation2]  }
 0x19d   :  { %1327 = vmatmul.mubr.msk.f32.vlgmr.msra.gmra.mxu0 %vm241_vm3, %v1470_v7  ;;  %1329 = vmatprep.subr.mxu0 %v754_v12  ;;  %v36_v7 = vld [vmem:[%s1642_s5 + $0x20] sm:$0xff]  ;;  %vm864_vm10 = vcmp.eq.s32.totalorder %v848_v51, %v1197_v50  ;;  %vm863_vm12 = vcmp.eq.s32.totalorder %v1508_v30, %v1197_v50  ;;  %s1164_s28 = sshll.u32 %s1401_s0, 4  ;;  %s1165_s28 = int_to_ptr.vmem [resolvable:$true] %s1164_s28 }
 0x19e   :  { %1330 = vmatpush3.msra.mxu0 %v754_v12  ;;  %v535_v20 = vrot.slane %v36_v7, 4  ;;  %v1199_v56 = vsel %vm864_vm10, 1.0, %v1399_v55  ;;  %s1374_s29 = scalar_lea.vmem %s1165_s28, 16  ;;  %s1378_s30 = scalar_lea.vmem %s1165_s28, 32 }
 0x19f   :  { %1331 = vmatprep.subr.mxu0 %v752_v5  ;;  %p1375_p0 = scmp.ne.s32.totalorder %s1165_s28, %s1374_s29  ;;  %p1379_p1 = scmp.lt.s32.totalorder %s1165_s28, %s1165_s28 }
 0x1a0   :  { %1332 = vmatpush3.msra.mxu0 %v752_v5  ;;  %v538_v23 = vsel %vm59_vm0, %v535_v20, %v537_v14  ;;  %v536_v28 = vsel %vm59_vm0, %v534_v25, %v535_v20  ;;  %p1380_p2 = scmp.lt.s32.totalorder %s1378_s30, %s1374_s29 }
 0x1a1   :  { %1333 = vmatprep.subr.mxu0 %v750_v6  ;;  %1315 = vmatprep.subr.mxu1 %v538_v23 }
 0x1a2   :  { %1334 = vmatpush3.msra.mxu0 %v750_v6  ;;  %1316 = vmatpush3.msra.mxu1 %v538_v23  ;;  %p1381_p3 = por %p1380_p2, %p1379_p1 }
 0x1a3   :  { %1335 = vmatprep.subr.mxu0 %v748_v18  ;;  %1317 = vmatprep.subr.mxu1 %v536_v28 }
 0x1a4   :  { %1336 = vmatpush3.msra.mxu0 %v748_v18  ;;  %1318 = vmatpush3.msra.mxu1 %v536_v28  ;;  %p1382_p4 = pnand %p1381_p3, %p1375_p0 }
 0x1a5   :  { %1337 = vmatprep.subr.mxu0 %v746_v24  ;;  %1348 = vmatprep.subr.msk.mxu1 %vm59_vm0, %v1196_v60 }
 0x1a6   :  { %1338 = vmatpush3.msra.mxu0 %v746_v24 }
 0x1a7   :  { %1339 = vmatprep.subr.mxu0 %v744_v29 }
 0x1a8   :  { %1340 = vmatpush3.msra.mxu0 %v744_v29 }
 0x1a9   :  { %1341 = vmatprep.subr.mxu0 %v742_v11 }
 0x1aa   :  { %1342 = vmatpush3.msra.mxu0 %v742_v11 }
 0x1ab   :  { %1343 = vmatprep.subr.mxu0 %v740_v32 }
 0x1ac   :  { %1344 = vmatpush3.msra.mxu0 %v740_v32 }
 0x1ad   :  { %1358 = vmatprep.subr.msk.mxu0 %vm248_vm1, %v1199_v56 }
 0x205   :  { %v514_v34 = vpop.permute.xlu0 %513 }
 0x209   :  { %v720_v36 = vpop.permute.xlu1 %719 }
 0x20a   :  { %v516_v39 = vpop.permute.xlu0 %515 }
 0x20d   :  { %v722_v45 = vpop.permute.xlu1 %721 }
 0x259   :  { %v1302_v35 = vpop.f32.mrf.mxu0 }
 0x25a   :  { %v521_v41 = vsel %vm519_vm8, %v1302_v35, %v516_v39 }
 0x25b   :  { %v502_v37 = vpop.f32.mrf.mxu0 }
 0x25c   :  { %v520_v40 = vsel %vm519_vm8, %v502_v37, %v514_v34 }
 0x25d   :  { %1319 = vmatprep.mubr.msk.f32.mxu1 %vm559_vm9, %v520_v40  ;;  %v1328_v43 = vpop.f32.mrf.mxu0 }
 0x25e   :  { %1320 = vmatmul.mubr.msk.f32.vlgmr.msra.gmra.mxu1 %vm559_vm9, %v521_v41  ;;  %v726_v38 = vsel %vm519_vm8, %v1328_v43, %v722_v45 }
 0x25f   :  { %v709_v44 = vpop.f32.mrf.mxu0  ;;  %1349 = vmatpush3.msk.msra.mxu1 %vm59_vm0, %v1196_v60 }
 0x260   :  { %v725_v46 = vsel %vm519_vm8, %v709_v44, %v720_v36  ;;  %1350 = vmatprep.subr.msk.mxu1 %vm853_vm13, %v1400_v63 }
 0x261   :  { %1345 = vmatprep.mubr.msk.f32.mxu0 %vm559_vm9, %v725_v46  ;;  %1351 = vmatpush3.msk.msra.mxu1 %vm853_vm13, %v1400_v63 }
 0x262   :  { %1346 = vmatmul.mubr.msk.f32.vlgmr.msra.gmra.mxu0 %vm559_vm9, %v726_v38 }
 0x263   :  { %1359 = vmatpush3.msk.msra.mxu0 %vm248_vm1, %v1199_v56 }
 0x264   :  { %1360 = vmatprep.subr.msk.mxu0 %vm863_vm12, %v1400_v63 }
 0x265   :  { %1361 = vmatpush3.msk.msra.mxu0 %vm863_vm12, %v1400_v63 }
 0x31e   :  { %v1321_v47 = vpop.f32.mrf.mxu1 }
 0x31f   :  { %v638_v61 = vadd.f32 %v1321_v47, %v525_v48 }
 0x320   :  { %v632_v52 = vpop.f32.mrf.mxu1 }
 0x321   :  { %v633_v53 = vadd.f32 %v632_v52, %v525_v48 }
 0x322   :  { %v1347_v54 = vpop.f32.mrf.mxu0 }
 0x323   :  { %1001 = vxpose.xlu1.b32.start [1/2] (short) (narrow) %v633_v53, 32  ;;  %v841_v33 = vadd.f32 %v1347_v54, %v730_v58 }
 0x324   :  { %v835_v59 = vpop.f32.mrf.mxu0 }
 0x325   :  { %v836_v62 = vadd.f32 %v835_v59, %v730_v58 }
 0x327   :  { %1002 = vxpose.xlu1.b32.end [2/2] (short) (narrow) %v638_v61, 32  ;;  %869 = vxpose.xlu0.b32.start [1/2] (short) (narrow) %v836_v62, 32 }
 0x32b   :  { %870 = vxpose.xlu0.b32.end [2/2] (short) (narrow) %v841_v33, 32 }
 0x39f   :  { %v1017_v0 = vpop.trf.xlu1 }
 0x3a0   :  { %1362 = vmatprep.mubr.msk.f32.mxu0 %vm241_vm3, %v1017_v0 }
 0x3a3   :  { %v885_v1 = vpop.trf.xlu0  ;;  %v1018_v2 = vpop.trf.xlu1 }
 0x3a4   :  { %1352 = vmatprep.mubr.msk.f32.mxu1 %vm52_vm2, %v885_v1  ;;  %1363 = vmatmul.mubr.msk.f32.vlgmr.msra.gmra.mxu0 %vm241_vm3, %v1018_v2 }
 0x3a7   :  { %v886_v3 = vpop.trf.xlu0  ;;  %v1019_v30 = vpop.trf.xlu1 }
 0x3a8   :  { %1353 = vmatmul.mubr.msk.f32.vlgmr.msra.gmra.mxu1 %vm52_vm2, %v886_v3  ;;  %1365 = vmatprep.mubr.msk.f32.mxu0 %vm241_vm3, %v1019_v30 }
 0x3ab   :  { %v887_v4 = vpop.trf.xlu0  ;;  %v1020_v8 = vpop.trf.xlu1 }
 0x3ac   :  { %1355 = vmatprep.mubr.msk.f32.mxu1 %vm52_vm2, %v887_v4  ;;  %1366 = vmatmul.mubr.msk.f32.gmra.mxu0 %vm241_vm3, %v1020_v8 }
 0x3af   :  { %v888_v9 = vpop.trf.xlu0 }
 0x3b0   :  { %1356 = vmatmul.mubr.msk.f32.gmra.mxu1 %vm52_vm2, %v888_v9 }
 0x464   :  { %v1364_v10 = vpop.f32.mrf.mxu0 }
 0x466   :  { %v1114_v14 = vpop.f32.mrf.mxu0 }
 0x468   :  { %v1354_v12 = vpop.f32.mrf.mxu1 }
 0x469   :  { %v1134_v16 = vmul.f32 %v1364_v10, %v1354_v12 }
 0x46a   :  { %v982_v13 = vpop.f32.mrf.mxu1 }
 0x46b   :  { %v1133_v5 = vmul.f32 %v1114_v14, %v982_v13  ;;  %v1138_v19 = vsel %vm146_vm5, %v1134_v16, 0.0 }
 0x46c   :  { %v1367_v15 = vpop.f32.mrf.mxu0 }
 0x46d   :  { %v1137_v17 = vsel %vm146_vm5, %v1133_v5, 0.0 }
 0x46e   :  { %v1124_v18 = vpop.f32.mrf.mxu0  ;;  %v1139_v22 = vadd.f32 %v1138_v19, %v1137_v17 }
 0x470   :  { %v1357_v6 = vpop.f32.mrf.mxu1 }
 0x471   :  { %v1136_v20 = vmul.f32 %v1367_v15, %v1357_v6 }
 0x472   :  { %v992_v7 = vpop.f32.mrf.mxu1 }
 0x473   :  { %v1135_v21 = vmul.f32 %v1124_v18, %v992_v7  ;;  %v1142_v25 = vsel %vm146_vm5, %v1136_v20, 0.0 }
 0x475   :  { %v1140_v23 = vsel %vm146_vm5, %v1135_v21, 0.0 }
 0x476   :  { %v1141_v24 = vadd.f32 %v1140_v23, %v1139_v22 }
 0x478   :  { %v1143_v26 = vadd.f32 %v1142_v25, %v1141_v24 }
 0x47a   :  { %v1144_v27 = vrot.slane %v1143_v26, 4 }
 0x47c   :  { %v1145_v28 = vadd.f32 %v1144_v27, %v1143_v26 }
 0x47e   :  { %v1146_v29 = vrot.slane %v1145_v28, 2 }
 0x480   :  { %v1147_v31 = vadd.f32 %v1146_v29, %v1145_v28 }
 0x482   :  { %v1148_v11 = vrot.slane %v1147_v31, 1 }
 0x484   :  { %v1149_v32 = vadd.f32 %v1148_v11, %v1147_v31 }
 0x486   :  { %1152 = vrot.lane.b32.xlu0 %v1149_v32, %s1396_s1  ;;  %v1150_v34 = vsub.f32 0.0, %v1149_v32 }
 0x4f8   :  { %v1153_v35 = vpop.permute.xlu0 %1152 }
 0x4f9   :  { %v1155_v36 = vsel %vm146_vm5, %v1150_v34, %v1153_v35 }
 0x4fa   :  { %1157 = vst.msk [vmem:[#allocation2] sm:$0x1] %vm1156_vm14, %v1155_v36 }
 0x4fb   :  { %1385 = shalt.err (!%p1382_p4)
}
 0x4fc   :  { %1167 = dma.vmem_to_hbm [thread:$0]  %s1165_s28, 16, %s1643_s6, [#allocation3]  }
 0x4fd   :  { %1394 = dma.done.wait [#allocation3], 16  }
 0x4fe   :  { %1395 = vsyncadd [#allocation3], 4294967280 }
 0x4ff   :  { %1171 = vsyncpa [#allocation3], 1 }

</bundles_post_ra>
